<compile_context>
chip_gen: v7x
topology: tpu7x:2x2x1
jax: 0.10.0
libtpu: 0.0.40
codegen_flags: <defaults>
</compile_context>

<pallas_src>
import jax
import jax.numpy as jnp
from jax import lax
from jax.experimental import pallas as pl
from jax.experimental.pallas import tpu as pltpu


_VMEM_LIMIT_BYTES = 64 * 1024 * 1024   # safe cap on v5e/v6e (128 MiB) and v7x (64 MiB)
_TILE_BUDGET_BYTES = 24 * 1024 * 1024  # per-step activation-block budget (double-buffered)
_TAPS = tuple((dy, dx) for dy in (-1, 0, 1) for dx in (-1, 0, 1))


# ---------------------------------------------------------------------------
# Small helpers
# ---------------------------------------------------------------------------

def _silu(x):
    # x * sigmoid(x) = x * 1/(1 + exp(-x)); exp + reciprocal both run on the EUP.
    return x * pl.reciprocal(1.0 + jnp.exp(-x), approx=True)


def _compiler_params(n_axes):
    return pltpu.CompilerParams(
        dimension_semantics=("parallel",) * n_axes,
        vmem_limit_bytes=_VMEM_LIMIT_BYTES,
    )


def _pick_spatial_tile(hw, per_lane_bytes):
    """Largest multiple-of-128 divisor of hw whose per-step (double-buffered)
    footprint fits the VMEM budget; full extent for non-128-divisible hw."""
    if hw % 128 != 0:
        return hw
    divisors = [t for t in range(128, hw + 1, 128) if hw % t == 0]
    fitting = [t for t in divisors if t * per_lane_bytes <= _TILE_BUDGET_BYTES]
    return max(fitting) if fitting else min(divisors)


def _to_tap_major(w4):
    """(Cout, Cin, 3, 3) OIHW -> (9, Cout, Cin) bf16, tap index = ky*3 + kx."""
    co, ci, kh, kw = w4.shape
    return jnp.transpose(w4, (2, 3, 0, 1)).reshape(kh * kw, co, ci).astype(jnp.bfloat16)


def _make_tap_masks(H, W):
    """(9, 1, H*W) f32 validity masks for SAME-padded 3x3 taps."""
    ys = jnp.arange(H).reshape(H, 1)
    xs = jnp.arange(W).reshape(1, W)
    rows = []
    for dy, dx in _TAPS:
        valid = ((ys + dy >= 0) & (ys + dy < H) &
                 (xs + dx >= 0) & (xs + dx < W))
        rows.append(valid.reshape(1, H * W))
    return jnp.stack(rows, axis=0).astype(jnp.float32)


# ---------------------------------------------------------------------------
# Kernels
# ---------------------------------------------------------------------------

def _conv1x1_kernel(x_ref, w_ref, b_ref, o_ref):
    # x_ref: (1, Cin, T)  w_ref: (Cout, Cin) bf16  b_ref: (Cout, 1) f32
    x = x_ref[0].astype(jnp.bfloat16)
    w = w_ref[...].astype(jnp.bfloat16)
    acc = jnp.dot(w, x, preferred_element_type=jnp.float32) + b_ref[...]
    o_ref[0] = _silu(acc).astype(o_ref.dtype)


def _dual_conv1x1_kernel(x1_ref, w1_ref, x2_ref, w2_ref, b_ref, o_ref):
    # Fused "concat along channels + 1x1 conv + SiLU": SiLU(W1@X1 + W2@X2 + b).
    acc = jnp.dot(w1_ref[...].astype(jnp.bfloat16), x1_ref[0].astype(jnp.bfloat16),
                  preferred_element_type=jnp.float32)
    acc = acc + jnp.dot(w2_ref[...].astype(jnp.bfloat16), x2_ref[0].astype(jnp.bfloat16),
                        preferred_element_type=jnp.float32)
    acc = acc + b_ref[...]
    o_ref[0] = _silu(acc).astype(o_ref.dtype)


def _make_bottleneck_kernel(H, W, add):
    """Fused Bottleneck: SiLU(conv3x3) -> SiLU(conv3x3) [+ residual], all in VMEM.

    3x3 convs are done as 9 accumulating matmuls over lane-rotated copies of the
    flattened (C, H*W) plane, with precomputed boundary masks (SAME padding).
    """
    HW = H * W

    def kernel(x_ref, w1_ref, b1_ref, w2_ref, b2_ref, m_ref, o_ref):
        x_f32 = x_ref[0].astype(jnp.float32)            # (C, HW)

        def conv3x3_silu(inp_f32, w_taps, b_vec):
            cout = w_taps.shape[1]
            acc = jnp.zeros((cout, HW), jnp.float32)
            for tap, (dy, dx) in enumerate(_TAPS):
                off = dy * W + dx                        # input offset for this tap
                shift = (-off) % HW
                shifted = inp_f32 if shift == 0 else pltpu.roll(inp_f32, shift, axis=1)
                tapped = (shifted * m_ref[tap]).astype(jnp.bfloat16)
                acc = acc + jnp.dot(w_taps[tap].astype(jnp.bfloat16), tapped,
                                    preferred_element_type=jnp.float32)
            acc = acc + b_vec[...]
            return _silu(acc)                            # f32, stays in VMEM

        t1 = conv3x3_silu(x_f32, w1_ref, b1_ref)         # (C_, HW)
        t2 = conv3x3_silu(t1, w2_ref, b2_ref)            # (C,  HW)
        out = t2 + x_f32 if add else t2
        o_ref[0] = out.astype(o_ref.dtype)

    return kernel


# ---------------------------------------------------------------------------
# pallas_call wrappers
# ---------------------------------------------------------------------------

def _conv1x1_silu(x3, w2d, bias, out_dtype):
    """x3: (B, Cin, HW); w2d: (Cout, Cin) bf16; bias: (Cout,). -> (B, Cout, HW)."""
    B, Cin, HW = x3.shape
    Cout = w2d.shape[0]
    in_b = jnp.dtype(x3.dtype).itemsize
    out_b = jnp.dtype(out_dtype).itemsize
    t = _pick_spatial_tile(HW, 2 * (Cin * in_b + Cout * out_b))
    grid = (B, HW // t)
    b2 = bias.reshape(Cout, 1).astype(jnp.float32)

    return pl.pallas_call(
        _conv1x1_kernel,
        out_shape=jax.ShapeDtypeStruct((B, Cout, HW), out_dtype),
        grid=grid,
        in_specs=[
            pl.BlockSpec((1, Cin, t), lambda bi, si: (bi, 0, si)),
            pl.BlockSpec((Cout, Cin), lambda bi, si: (0, 0)),
            pl.BlockSpec((Cout, 1), lambda bi, si: (0, 0)),
        ],
        out_specs=pl.BlockSpec((1, Cout, t), lambda bi, si: (bi, 0, si)),
        compiler_params=_compiler_params(2),
    )(x3, w2d, b2)


def _dual_conv1x1_silu(x1_3, w_a, y3, half_block_index, c_half, w_b, bias, out_dtype):
    """SiLU(Wa @ X1 + Wb @ X2 + b), X2 = channel-half of y3 selected in place via
    the BlockSpec channel block offset (the concat is never materialized)."""
    B, K1, HW = x1_3.shape
    Cout = w_a.shape[0]
    in_b = jnp.dtype(x1_3.dtype).itemsize
    y_b = jnp.dtype(y3.dtype).itemsize
    out_b = jnp.dtype(out_dtype).itemsize
    t = _pick_spatial_tile(HW, 2 * (K1 * in_b + c_half * y_b + Cout * out_b))
    grid = (B, HW // t)
    b2 = bias.reshape(Cout, 1).astype(jnp.float32)

    return pl.pallas_call(
        _dual_conv1x1_kernel,
        out_shape=jax.ShapeDtypeStruct((B, Cout, HW), out_dtype),
        grid=grid,
        in_specs=[
            pl.BlockSpec((1, K1, t), lambda bi, si: (bi, 0, si)),
            pl.BlockSpec((Cout, K1), lambda bi, si: (0, 0)),
            pl.BlockSpec((1, c_half, t), lambda bi, si: (bi, half_block_index, si)),
            pl.BlockSpec((Cout, c_half), lambda bi, si: (0, 0)),
            pl.BlockSpec((Cout, 1), lambda bi, si: (0, 0)),
        ],
        out_specs=pl.BlockSpec((1, Cout, t), lambda bi, si: (bi, 0, si)),
        compiler_params=_compiler_params(2),
    )(x1_3, w_a, y3, w_b, b2)


def _bottleneck_fused(x3, w1_t, b1, w2_t, b2, masks, add, H, W):
    """x3: (B, C, HW) bf16.  One pallas_call per Bottleneck (both 3x3 convs)."""
    B, C, HW = x3.shape
    Cmid = w1_t.shape[1]
    Cout = w2_t.shape[1]
    kernel = _make_bottleneck_kernel(H, W, add)

    return pl.pallas_call(
        kernel,
        out_shape=jax.ShapeDtypeStruct((B, Cout, HW), x3.dtype),
        grid=(B,),
        in_specs=[
            pl.BlockSpec((1, C, HW), lambda bi: (bi, 0, 0)),
            pl.BlockSpec((9, Cmid, C), lambda bi: (0, 0, 0)),
            pl.BlockSpec((Cmid, 1), lambda bi: (0, 0)),
            pl.BlockSpec((9, Cout, Cmid), lambda bi: (0, 0, 0)),
            pl.BlockSpec((Cout, 1), lambda bi: (0, 0)),
            pl.BlockSpec((9, 1, HW), lambda bi: (0, 0, 0)),
        ],
        out_specs=pl.BlockSpec((1, Cout, HW), lambda bi: (bi, 0, 0)),
        compiler_params=_compiler_params(1),
    )(x3, w1_t, b1.reshape(Cmid, 1).astype(jnp.float32),
      w2_t, b2.reshape(Cout, 1).astype(jnp.float32), masks)


# ---------------------------------------------------------------------------
# C2 forward (Pallas) and pure-JAX reference
# ---------------------------------------------------------------------------

def c2_forward(x, params, act_dtype=jnp.bfloat16):
    """Pallas forward of C2 (BatchNorm folded into conv weight/bias)."""
    cv1_w, cv1_b = params["cv1"]
    cv2_w, cv2_b = params["cv2"]
    B, Cin, H, W = x.shape
    HW = H * W
    x3 = x.reshape(B, Cin, HW)

    # cv1: 1x1 conv -> 2c channels, stored bf16.
    w_cv1 = cv1_w.reshape(cv1_w.shape[0], Cin).astype(jnp.bfloat16)
    y = _conv1x1_silu(x3, w_cv1, cv1_b, act_dtype)      # (B, 2c, HW)
    c = y.shape[1] // 2

    # Bottlenecks on the first channel half (each fused into one kernel).
    masks = _make_tap_masks(H, W)
    h = y[:, :c]
    for (w1, b1), (w2, b2), add in params["m"]:
        h = _bottleneck_fused(h, _to_tap_major(w1), b1, _to_tap_major(w2), b2,
                              masks, add, H, W)

    # cv2 on cat([m(a), b]); the concat is fused away when channels are aligned.
    Cout = cv2_w.shape[0]
    w_cv2 = cv2_w.reshape(Cout, 2 * c).astype(jnp.bfloat16)
    align = 16 if jnp.dtype(act_dtype) == jnp.dtype(jnp.bfloat16) else 8
    if c % align == 0:
        out3 = _dual_conv1x1_silu(h, w_cv2[:, :c], y, 1, c, w_cv2[:, c:],
                                  cv2_b, x.dtype)
    else:
        z = jnp.concatenate([h, y[:, c:]], axis=1)
        out3 = _conv1x1_silu(z, w_cv2, cv2_b, x.dtype)
    return out3.reshape(B, Cout, H, W)


def _conv_bn_silu_ref(x, w4, bias):
    y = lax.conv_general_dilated(
        x, w4, window_strides=(1, 1), padding="SAME",
        dimension_numbers=("NCHW", "OIHW", "NCHW"),
        precision=lax.Precision.HIGHEST)
    y = y + bias[None, :, None, None]
    return y * jax.nn.sigmoid(y)


def c2_reference(x, params):
    cv1_w, cv1_b = params["cv1"]
    cv2_w, cv2_b = params["cv2"]
    y = _conv_bn_silu_ref(x, cv1_w, cv1_b)
    c = y.shape[1] // 2
    a, b = y[:, :c], y[:, c:]
    h = a
    for (w1, b1), (w2, b2), add in params["m"]:
        t1 = _conv_bn_silu_ref(h, w1, b1)
        t2 = _conv_bn_silu_ref(t1, w2, b2)
        h = h + t2 if add else t2
    return _conv_bn_silu_ref(jnp.concatenate([h, b], axis=1), cv2_w, cv2_b)


# ---------------------------------------------------------------------------
# Parameter construction (Conv2d weight + BatchNorm2d, folded for inference)
# ---------------------------------------------------------------------------

def _make_conv_params(key, c_in, c_out, k):
    kw, kg, kb, km, kv = jax.random.split(key, 5)
    w = jax.random.normal(kw, (c_out, c_in, k, k), jnp.float32)
    w = w * (c_in * k * k) ** -0.5
    gamma = 1.0 + 0.1 * jax.random.normal(kg, (c_out,), jnp.float32)
    beta = 0.1 * jax.random.normal(kb, (c_out,), jnp.float32)
    mean = 0.1 * jax.random.normal(km, (c_out,), jnp.float32)
    var = jnp.abs(1.0 + 0.1 * jax.random.normal(kv, (c_out,), jnp.float32))
    eps = 1e-3  # ultralytics Conv uses BatchNorm2d(eps=1e-3)
    scale = gamma / jnp.sqrt(var + eps)
    w_f = (w * scale[:, None, None, None]).astype(jnp.float32)
    b_f = (beta - mean * scale).astype(jnp.float32)
    return w_f, b_f


# ---------------------------------------------------------------------------
# Demo / self-check
# ---------------------------------------------------------------------------

if __name__ == "__main__":
    # C2(c1=32, c2=32, n=1, shortcut=True, e=0.5) on a (2, 32, 16, 16) input.
    B, C1, C2_OUT, H, W = 2, 32, 32, 16, 16
    n, e, shortcut = 1, 0.5, True
    c = int(C2_OUT * e)

    key = jax.random.PRNGKey(0)
    keys = jax.random.split(key, 3 + 2 * n)
    k_x, k_cv1, k_cv2 = keys[0], keys[1], keys[2]
    k_m = keys[3:]

    x = jax.random.normal(k_x, (B, C1, H, W), jnp.float32)

    params = {
        "cv1": _make_conv_params(k_cv1, C1, 2 * c, 1),
        "cv2": _make_conv_params(k_cv2, 2 * c, C2_OUT, 1),
        "m": [(_make_conv_params(k_m[2 * i], c, c, 3),
               _make_conv_params(k_m[2 * i + 1], c, c, 3),
               bool(shortcut)) for i in range(n)],
    }

    out = c2_forward(x, params)
    jax.block_until_ready(out)

    ref = c2_reference(x, params)
    assert out.shape == (B, C2_OUT, H, W), out.shape
    max_err = float(jnp.max(jnp.abs(out.astype(jnp.float32) - ref)))
    # bf16 activations + bf16 MXU operands: tolerance loosened vs the f32 path.
    assert max_err < 1e-1, f"mismatch vs reference: max abs err {max_err}"

    print("KERNEL_OK")
</pallas_src>

<mosaic_0001>
module attributes {stable_mosaic.version = 11 : i64} {
  func.func @_conv1x1_kernel(%arg0: i32, %arg1: i32, %arg2: memref<1x32x256xf32, #tpu.memory_space<vmem>>, %arg3: memref<32x32xbf16, #tpu.memory_space<vmem>>, %arg4: memref<32x1xf32, #tpu.memory_space<vmem>>, %arg5: memref<1x32x256xbf16, #tpu.memory_space<vmem>>) attributes {dimension_semantics = [#tpu.dimension_semantics<parallel>, #tpu.dimension_semantics<parallel>], iteration_bounds = array<i64: 2, 1>, scalar_prefetch = 0 : i64, scratch_operands = 0 : i64, tpu.core_type = #tpu.core_type<tc>, window_params = [{transform_indices = @transform_0, window_bounds = array<i64: 1, 32, 256>}, {pipeline_mode = #tpu.pipeline_mode<synchronous>, transform_indices = @transform_1, window_bounds = array<i64: 32, 32>}, {pipeline_mode = #tpu.pipeline_mode<synchronous>, transform_indices = @transform_2, window_bounds = array<i64: 32, 1>}, {transform_indices = @transform_3, window_bounds = array<i64: 1, 32, 256>}]} {
    %c0 = arith.constant 0 : index
    %c0_0 = arith.constant 0 : index
    %c0_1 = arith.constant 0 : index
    %0 = vector.load %arg2[%c0, %c0_0, %c0_1] : memref<1x32x256xf32, #tpu.memory_space<vmem>>, vector<1x32x256xf32>
    %1 = vector.shape_cast %0 : vector<1x32x256xf32> to vector<32x256xf32>
    %2 = arith.truncf %1 : vector<32x256xf32> to vector<32x256xbf16>
    %c0_2 = arith.constant 0 : index
    %c0_3 = arith.constant 0 : index
    %3 = vector.load %arg3[%c0_2, %c0_3] : memref<32x32xbf16, #tpu.memory_space<vmem>>, vector<32x32xbf16>
    %cst = arith.constant dense<0.000000e+00> : vector<32x256xf32>
    %4 = tpu.matmul %3, %2, %cst {dimension_numbers = #tpu.dot_dimension_numbers<[1], [0], [0], [1], [0, 0, 1, 1], [], []>} : vector<32x32xbf16>, vector<32x256xbf16>, vector<32x256xf32> -> vector<32x256xf32>
    %c0_4 = arith.constant 0 : index
    %c0_5 = arith.constant 0 : index
    %5 = vector.load %arg4[%c0_4, %c0_5] : memref<32x1xf32, #tpu.memory_space<vmem>>, vector<32x1xf32>
    %6 = vector.broadcast %5 : vector<32x1xf32> to vector<32x256xf32>
    %7 = arith.addf %4, %6 : vector<32x256xf32>
    %cst_6 = arith.constant 0.000000e+00 : f32
    %8 = vector.broadcast %cst_6 : f32 to vector<32x256xf32>
    %9 = arith.subf %8, %7 : vector<32x256xf32>
    %10 = math.exp %9 : vector<32x256xf32>
    %cst_7 = arith.constant 1.000000e+00 : f32
    %11 = vector.broadcast %cst_7 : f32 to vector<32x256xf32>
    %12 = arith.addf %11, %10 : vector<32x256xf32>
    %13 = tpu.reciprocal %12 {approx = true} : vector<32x256xf32> -> vector<32x256xf32>
    %14 = arith.mulf %7, %13 : vector<32x256xf32>
    %15 = arith.truncf %14 : vector<32x256xf32> to vector<32x256xbf16>
    %c0_8 = arith.constant 0 : index
    %c0_9 = arith.constant 0 : index
    %c0_10 = arith.constant 0 : index
    %16 = vector.load %arg5[%c0_8, %c0_9, %c0_10] : memref<1x32x256xbf16, #tpu.memory_space<vmem>>, vector<1x32x256xbf16>
    %17 = vector.shape_cast %16 : vector<1x32x256xbf16> to vector<32x256xbf16>
    %18 = vector.shape_cast %15 : vector<32x256xbf16> to vector<1x32x256xbf16>
    tpu.vector_store %arg5[%c0_8, %c0_9, %c0_10], %18 {strides = array<i32>} : memref<1x32x256xbf16, #tpu.memory_space<vmem>>, vector<1x32x256xbf16>,
    return
  }
  func.func @transform_0(%arg0: i32, %arg1: i32) -> (i32, i32, i32) {
    %c0_i32 = arith.constant 0 : i32
    %c0_i32_0 = arith.constant 0 : i32
    return %arg0, %c0_i32, %arg1 : i32, i32, i32
  }
  func.func @transform_1(%arg0: i32, %arg1: i32) -> (i32, i32) {
    %c0_i32 = arith.constant 0 : i32
    %c0_i32_0 = arith.constant 0 : i32
    %c0_i32_1 = arith.constant 0 : i32
    return %c0_i32, %c0_i32_0 : i32, i32
  }
  func.func @transform_2(%arg0: i32, %arg1: i32) -> (i32, i32) {
    %c0_i32 = arith.constant 0 : i32
    %c0_i32_0 = arith.constant 0 : i32
    %c0_i32_1 = arith.constant 0 : i32
    return %c0_i32, %c0_i32_0 : i32, i32
  }
  func.func @transform_3(%arg0: i32, %arg1: i32) -> (i32, i32, i32) {
    %c0_i32 = arith.constant 0 : i32
    %c0_i32_0 = arith.constant 0 : i32
    return %arg0, %c0_i32, %arg1 : i32, i32, i32
  }
}

</mosaic_0001>

<bundles_post_ra>
// kernel: tpu_custom_call.1
= control target key start
LH: loop header
LB: loop body
LE: loop exit
PB: predicated region body
PF: predicated region fallthrough
CT: control target
= control target key end

     0   :  { %8 = vsyncpa [#allocation3], 0  ;;  %s1207_s0 = inlined_call_operand.hbm [shape: f32[2,32,256], index: 0, kind: input, shape index: {}]   ;;  %s1208_s1 = inlined_call_operand.hbm [shape: bf16[32,32], index: 1, kind: input, shape index: {}]   ;;  %s1209_s2 = inlined_call_operand.hbm [shape: f32[32,1], index: 2, kind: input, shape index: {}]   ;;  %s1210_s3 = inlined_call_operand.hbm [shape: bf16[2,32,256], index: 3, kind: output, shape index: {}]  }
   0x1   :  { %10 = vsyncpa [#allocation3 + $0x1], 0 }
   0x2   :  { %11 = vsyncpa [#allocation6], 0 }
   0x3   :  { %12 = vsyncpa [#allocation4], 0 }
   0x4   :  { %14 = vsyncpa [#allocation4 + $0x1], 0  ;;  %s919_s12 = smov 0   ;;  %s921_s13 = smov 0  }
   0x5   :  { %s923_s14 = smov 0   ;;  %s925_s15 = smov 0  }
   0x6   :  { %s927_s16 = smov 0   ;;  %s929_s17 = smov 0  }
   0x7 LB: > { %s547_s18 = sadd.s32 4294967295, %s884_s17   ;;  %s548_s19 = sadd.s32 4294967294, %s884_s17   ;;  %s884_s17 = sphi %s929_s17, %s20_s17   ;;  %s880_s16 = sphi %s927_s16, %s1232_s16   ;;  %s876_s15 = sphi %s925_s15, %s1231_s15   ;;  %s872_s14 = sphi %s923_s14, %s1230_s14   ;;  %s868_s13 = sphi %s921_s13, %s1229_s13   ;;  %s864_s12 = sphi %s919_s12, %s1228_s12  }
   0x8   : > { %p54_p0 = scmp.ne.s32.totalorder %s868_s13, %s864_s12  ;;  %p953_p1 = scmp.eq.s32.totalorder %s547_s18, 0 }
   0x9   : > { %p957_p2 = scmp.eq.s32.totalorder %s547_s18, 1  ;;  %p128_p3 = scmp.eq.s32.totalorder %s548_s19, 1 }
   0xa   : > { %s1215_s20 = scalar_select %p953_p1, 1, 0 }
   0xb   : > { %p963_p4 = por %p953_p1, %p54_p0  ;;  %p549_p5 = scmp.ge.s32.totalorder %s884_s17, 1 }
   0xc   : > { %p968_p6 = por %p128_p3, %p54_p0  ;;  %p135_p7 = scmp.lt.s32.totalorder %s884_s17, 3 }
   0xd   : > { %s1217_s22 = scalar_select %p963_p4, 1, 0 }
   0xe   : > { %s1218_s23 = scalar_select %p968_p6, 1, 0 }
   0xf   : > { %p973_p8 = pnand %p549_p5, %p135_p7  ;;  %s886_s25 = smov [#allocation5]  }
  0x10   : > { %s147_s26 = sshll.u32 %s886_s25, 4  ;;  %s887_s28 = smov [#allocation7]   ;;  %s977_s26 = int_to_ptr.vmem [resolvable:$true] %s147_s26 }
  0x11   : > { %p596_p9 = pneg %p973_p8  ;;  %s160_s29 = sshll.u32 %s887_s28, 4  ;;  %s988_s29 = int_to_ptr.vmem [resolvable:$true] %s160_s29 }
  0x12   : > { %s712_s5 = scalar_lea.hbm %s1208_s1, 256 }
  0x13   : > { %p984_p11 = pnand %p596_p9, %p953_p1  ;;  %p713_p12 = scmp.ne.s32.totalorder %s1208_s1, %s712_s5 }
  0x14   : > { %p719_p5 = scmp.lt.u32.totalorder %s712_s5, %s1208_s1 }
  0x15   : > { %p714_p13 = pneg %p984_p11 }
  0x17   : > { %p715_p0 = pnand %p714_p13, %p713_p12 }
  0x19   : > { %p716_p3 = pneg %p715_p0 }
  0x1b   : > { %p721_p7 = pnand %p719_p5, %p716_p3 }
  0x1d   : > { %724 = shalt.err (!%p721_p7)
}
  0x1e   : > { %s725_s10 = scalar_lea.vmem %s977_s26, 256  ;;  %p733_p1 = scmp.lt.s32.totalorder %s977_s26, %s977_s26 }
  0x1f   : > { %p726_p9 = scmp.ne.s32.totalorder %s977_s26, %s725_s10  ;;  %p734_p12 = scmp.lt.s32.totalorder %s725_s10, %s725_s10 }
  0x21   : > { %p728_p10 = pnand %p726_p9, %p714_p13  ;;  %p735_p0 = por %p734_p12, %p733_p1 }
  0x23   : > { %p729_p6 = pneg %p728_p10 }
  0x25   : > { %p736_p4 = pnand %p735_p0, %p729_p6 }
  0x27   : > { %739 = shalt.err (!%p736_p4)
}
  0x28   : > { %s888_s11 = smov 64   ;;  %s889_s18 = smov 4  }
  0x29   : > { %599 = dma.hbm_to_vmem [thread:$0]  (!%p984_p11), %s1208_s1, 256, %s977_s26, [#allocation6], %s888_s11, %s888_s11, %s889_s18  }
  0x2a   : > { %s740_s4 = scalar_lea.hbm %s1209_s2, 512 }
  0x2b   : > { %p741_p1 = scmp.ne.s32.totalorder %s1209_s2, %s740_s4  ;;  %p747_p10 = scmp.lt.u32.totalorder %s740_s4, %s1209_s2 }
  0x2d   : > { %p743_p4 = pnand %p741_p1, %p714_p13 }
  0x2f   : > { %p744_p6 = pneg %p743_p4 }
  0x31   : > { %p749_p3 = pnand %p747_p10, %p744_p6 }
  0x33   : > { %752 = shalt.err (!%p749_p3)
}
  0x34   : > { %s753_s26 = scalar_lea.vmem %s988_s29, 512  ;;  %p761_p12 = scmp.lt.s32.totalorder %s988_s29, %s988_s29 }
  0x35   : > { %p754_p5 = scmp.ne.s32.totalorder %s988_s29, %s753_s26  ;;  %p762_p0 = scmp.lt.s32.totalorder %s753_s26, %s753_s26 }
  0x37   : > { %p756_p7 = pnand %p754_p5, %p714_p13  ;;  %p763_p1 = por %p762_p0, %p761_p12 }
  0x39   : > { %p757_p9 = pneg %p756_p7 }
  0x3b   : > { %p764_p4 = pnand %p763_p1, %p757_p9 }
  0x3d   : > { %767 = shalt.err (!%p764_p4)
}
  0x3e   : > { %s890_s9 = smov 128   ;;  %s891_s10 = smov 8  }
  0x3f   : > { %602 = dma.hbm_to_vmem [thread:$0]  (!%p984_p11), %s1209_s2, 512, %s988_s29, [#allocation6], %s890_s9, %s890_s9, %s891_s10  }
  0x40   : > { %s32_s19 = sadd.s32 1, %s880_s16  ;;  %s41_s25 = sadd.s32 1, %s872_s14 }
  0x41   : > { %p34_p13 = scmp.ge.s32.totalorder %s32_s19, 2  ;;  %p48_p6 = scmp.ne.s32.totalorder %s872_s14, %s868_s13 }
  0x42   : > { %p49_p10 = scmp.eq.s32.totalorder %s884_s17, 0  ;;  %p613_p3 = scmp.lt.s32.totalorder %s884_s17, 2 }
  0x43   : > { %s1234_s19 = smov (%p34_p13, %s32_s19), 0  ;;  %p1052_p7 = por %p957_p2, %p48_p6 }
  0x44   : > { %p50_p5 = por %p49_p10, %p48_p6  ;;  %s36_s27 = ssub.s32 %s880_s16, %s1234_s19 }
  0x45   : > { %s1221_s28 = scalar_select %p1052_p7, 1, 0 }
  0x46   : > { %s174_s30 = sand.u32 1, %s872_s14   ;;  %p39_p9 = scmp.eq.s32.totalorder %s36_s27, 0 }
  0x47   : > { %s553_s29 = sshll.u32 %s174_s30, 6  ;;  %s574_s4 = sshll.u32 %s880_s16, 10 }
  0x48   : > { %s1061_s5 = scalar_select %p39_p9, %s872_s14, %s41_s25  }
  0x49   : > { %s1066_s8 = scalar_lea.hbm %s1207_s0, %s574_s4  ;;  %s178_s21 = scalar_lea.vmem [#allocation2], %s553_s29 }
  0x4a   : > { %s187_s26 = sshll.u32 %s178_s21, 4  ;;  %p1070_p2 = pnand %p613_p3, %p50_p5  ;;  %s1074_s26 = int_to_ptr.vmem [resolvable:$true] %s187_s26 }
  0x4b   : > { %s1076_s10 = scalar_lea.sflag [#allocation3], %s174_s30  ;;  %s768_s11 = scalar_lea.hbm %s1066_s8, 1024 }
  0x4c   : > { %p769_p11 = scmp.ne.s32.totalorder %s1066_s8, %s768_s11  ;;  %p770_p12 = pneg %p1070_p2 }
  0x4d   : > { %s773_s27 = scalar_lea.hbm %s1207_s0, 2048  ;;  %p774_p4 = scmp.lt.u32.totalorder %s1066_s8, %s1207_s0 }
  0x4e   : > { %p771_p0 = pnand %p770_p12, %p769_p11  ;;  %p775_p13 = scmp.lt.u32.totalorder %s773_s27, %s768_s11 }
  0x4f   : > { %p777_p10 = scmp.lt.u32.totalorder %s768_s11, %s1066_s8 }
  0x50   : > { %p772_p1 = pneg %p771_p0  ;;  %p776_p6 = por %p775_p13, %p774_p4 }
  0x52   : > { %p778_p3 = por %p777_p10, %p776_p6 }
  0x54   : > { %p779_p5 = pnand %p778_p3, %p772_p1 }
  0x56   : > { %782 = shalt.err (!%p779_p5)
}
  0x57   : > { %s783_s30 = scalar_lea.vmem %s1074_s26, 1024  ;;  %s892_s6 = smov [#allocation2]  }
  0x58   : > { %p784_p9 = scmp.ne.s32.totalorder %s1074_s26, %s783_s30  ;;  %s788_s7 = sshll.u32 %s892_s6, 4  ;;  %s789_s7 = int_to_ptr.vmem [resolvable:$false] %s788_s7 }
  0x59   : > { %s790_s21 = scalar_lea.vmem %s789_s7, 2048  ;;  %p791_p7 = scmp.lt.s32.totalorder %s1074_s26, %s789_s7 }
  0x5a   : > { %p786_p11 = pnand %p784_p9, %p770_p12  ;;  %p792_p4 = scmp.lt.s32.totalorder %s790_s21, %s783_s30 }
  0x5c   : > { %p787_p0 = pneg %p786_p11  ;;  %p793_p13 = por %p792_p4, %p791_p7 }
  0x5e   : > { %p794_p6 = pnand %p793_p13, %p787_p0 }
  0x60   : > { %797 = shalt.err (!%p794_p6)
}
  0x61   : > { %s893_s11 = smov 256   ;;  %s894_s18 = smov 16  }
  0x62   : > { %606 = dma.hbm_to_vmem [thread:$0]  (!%p1070_p2), %s1066_s8, 1024, %s1074_s26, %s1076_s10, %s893_s11, %s893_s11, %s894_s18  }
  0x63   : > { %199 = sbr.rel (%p973_p8) target bundleno = 389 (0x185), region = 32  ;;  %s1107_s25 = sand.u32 (!%p973_p8), 1, %s868_s13  }
  0x64   : > { %s557_s27 = sshll.u32 (!%p973_p8), %s1107_s25, 6  ;;  %s202_s29 = scalar_lea.sflag (!%p973_p8), [#allocation3], %s1107_s25 }
  0x65   : > { %s205_s4 = scalar_lea.vmem (!%p973_p8), [#allocation2], %s557_s27  ;;  %p1223_p7 = scmp.ne.s32.totalorder (!%p973_p8), %s1217_s22, 0 }
  0x6a   : > { %851 = dma.done.wait (%p1223_p7), %s202_s29, 1024  }
  0x6b   : > { %853 = vsyncadd (%p1223_p7), %s202_s29, 4294966272  ;;  %p1224_p12 = scmp.ne.s32.totalorder %s1215_s20, 0 }
  0x6d   : > { %855 = dma.done.wait (%p1224_p12), [#allocation6], 768  }
  0x6e   : > { %857 = vsyncadd (%p1224_p12), [#allocation6], 4294966528  ;;  %v895_v0 = vmov 0   ;;  %v240_v1 = vld [vmem:[%s205_s4 + $0x8] sm:$0xff]  ;;  %v242_v2 = vld [vmem:[%s205_s4 + $0x18] sm:$0xff]  ;;  %vm289_vm0 = vcmask 261120  }
  0x6f   : > { %328 = vmatprep.mubr.bf16.mxu0 %v895_v0  ;;  %338 = vmatprep.mubr.bf16.mxu1 %v895_v0  ;;  %v239_v3 = vld [vmem:[%s205_s4] sm:$0xff]  ;;  %v248_v4 = vpack.c.bf16 %v242_v2, %v240_v1  ;;  %v241_v5 = vld [vmem:[%s205_s4 + $0x10] sm:$0xff]  ;;  %v244_v6 = vld [vmem:[%s205_s4 + $0x28] sm:$0xff]  ;;  %s560_s20 = sshll.u32 %s1107_s25, 5  ;;  %s579_s8 = sshll.u32 %s876_s15, 9 }
  0x70   : > { %677 = vset.pattern.permute.xlu1 %v895_v0  ;;  %676 = vset.pattern.permute.xlu0 %v895_v0  ;;  %v246_v7 = vld [vmem:[%s205_s4 + $0x38] sm:$0xff]  ;;  %v247_v8 = vpack.c.bf16 %v241_v5, %v239_v3  ;;  %v243_v10 = vld [vmem:[%s205_s4 + $0x20] sm:$0xff]  ;;  %v245_v11 = vld [vmem:[%s205_s4 + $0x30] sm:$0xff]  ;;  %s235_s22 = scalar_lea.vmem [#allocation8], %s560_s20  ;;  %s1158_s10 = scalar_lea.hbm %s1210_s3, %s579_s8 }
  0x71   : > { %v250_v9 = vpack.c.bf16 %v246_v7, %v244_v6  ;;  %296 = vmatprep.subr.bf16.mxu0 %v248_v4  ;;  %580 = vmatprep.subr.bf16.mxu1 %v248_v4  ;;  %v249_v12 = vpack.c.bf16 %v245_v11, %v243_v10  ;;  %v257_v13 = vld [vmem:[#allocation7 + $0x10] sm:$0xff]  ;;  %v255_v14 = vld [vmem:[#allocation7] sm:$0xff]  ;;  %v679_v16 = vld [vmem:[#allocation5 + $0x8] sm:$0xff]   ;;  %s441_s24 = sshll.u32 %s235_s22, 4  ;;  %s426_s15 = scalar_lea.sflag [#allocation4], %s1107_s25  ;;  %s1152_s24 = int_to_ptr.vmem [resolvable:$true] %s441_s24 }
  0x72   : > { %297 = vmatpush1.bf16.msra.mxu0 %v247_v8  ;;  %582 = vmatpush1.bf16.msra.mxu1 %v247_v8  ;;  %v678_v15 = vld [vmem:[#allocation5] sm:$0xff]   ;;  %v258_v17 = vld [vmem:[#allocation7 + $0x18] sm:$0xff]  ;;  %v256_v18 = vld [vmem:[#allocation7 + $0x8] sm:$0xff]  ;;  %s798_s30 = scalar_lea.vmem %s1152_s24, 512  ;;  %p1225_p2 = scmp.ne.s32.totalorder %s1221_s28, 0 }
  0x73   : > { %298 = vmatprep.subr.bf16.mxu0 %v250_v9  ;;  %581 = vmatprep.subr.bf16.mxu1 %v250_v9  ;;  %p799_p8 = scmp.ne.s32.totalorder %s1152_s24, %s798_s30  ;;  %s896_s6 = smov [#allocation8]  }
  0x74   : > { %271 = vperm.xlu1 %677, %v257_v13   ;;  %261 = vperm.xlu0 %676, %v255_v14   ;;  %s802_s7 = sshll.u32 %s896_s6, 4  ;;  %s803_s7 = int_to_ptr.vmem [resolvable:$false] %s802_s7 }
  0x75   : > { %p800_p1 = pnand %p799_p8, %p1225_p2  ;;  %s804_s21 = scalar_lea.vmem %s803_s7, 1024 }
  0x76   : > { %299 = vmatpush1.bf16.msra.mxu0 %v249_v12  ;;  %583 = vmatpush1.bf16.msra.mxu1 %v249_v12  ;;  %p805_p3 = scmp.lt.s32.totalorder %s1152_s24, %s803_s7  ;;  %p806_p5 = scmp.lt.s32.totalorder %s804_s21, %s798_s30 }
  0x77   : > { %p801_p10 = pneg %p800_p1 }
  0x78   : > { %276 = vperm.xlu1 %677, %v258_v17   ;;  %266 = vperm.xlu0 %676, %v256_v18   ;;  %p807_p9 = por %p806_p5, %p805_p3 }
  0x79   : > { %563 = vmatmul.mubr.msk.bf16.vlgmr.msra.gmra.mrb[0].mxu0 %vm289_vm0, %v678_v15  ;;  %564 = vmatmul.mubr.msk.bf16.vlgmr.msra.gmra.mrb[0].mxu1 %vm289_vm0, %v679_v16 }
  0x7a   : > { %p808_p11 = pnand %p807_p9, %p801_p10 }
  0xf3   : > { %v272_v19 = vpop.permute.xlu1 %271  ;;  %v262_v20 = vpop.permute.xlu0 %261 }
  0xf7   : > { %v277_v21 = vpop.permute.xlu1 %276  ;;  %v267_v22 = vpop.permute.xlu0 %266 }
 0x14c   : > { %v330_v23 = vpop.f32.mrb[0].mxu0  ;;  %v340_v24 = vpop.f32.mrb[0].mxu1 }
 0x14d   : > { %v1119_v25 = vadd.f32 %v330_v23, %v262_v20  ;;  %v1121_v26 = vadd.f32 %v340_v24, %v272_v19  ;;  %v332_v27 = vpop.f32.mrb[1].mxu0  ;;  %v342_v28 = vpop.f32.mrb[1].mxu1 }
 0x14e   : > { %v1123_v29 = vadd.f32 %v332_v27, %v262_v20  ;;  %v1125_v30 = vadd.f32 %v342_v28, %v272_v19  ;;  %v334_v31 = vpop.f32.mrb[2].mxu0  ;;  %v344_v32 = vpop.f32.mrb[2].mxu1 }
 0x14f   : > { %v349_v33 = vsub.f32 0.0, %v1119_v25  ;;  %v353_v34 = vsub.f32 0.0, %v1121_v26  ;;  %v1129_v35 = vadd.f32 %v334_v31, %v267_v22  ;;  %v1131_v36 = vadd.f32 %v344_v32, %v277_v21  ;;  %v336_v37 = vpop.f32.mrb[3].mxu0  ;;  %v346_v38 = vpop.f32.mrb[3].mxu1 }
 0x150   : > { %v350_v39 = vsub.f32 0.0, %v1123_v29  ;;  %v354_v40 = vsub.f32 0.0, %v1125_v30  ;;  %v1135_v41 = vadd.f32 %v336_v37, %v267_v22  ;;  %v1137_v42 = vadd.f32 %v346_v38, %v277_v21 }
 0x151   : > { %v357_v43 = vmul.f32 1.442695, %v349_v33  ;;  %v365_v44 = vmul.f32 1.442695, %v353_v34  ;;  %v351_v45 = vsub.f32 0.0, %v1129_v35  ;;  %v355_v46 = vsub.f32 0.0, %v1131_v36 }
 0x152   : > { %v359_v47 = vmul.f32 1.442695, %v350_v39  ;;  %v367_v48 = vmul.f32 1.442695, %v354_v40  ;;  %v352_v49 = vsub.f32 0.0, %v1135_v41  ;;  %v356_v50 = vsub.f32 0.0, %v1137_v42 }
 0x153   : > { %680 = vpow2.f32 %v357_v43  ;;  %v361_v51 = vmul.f32 1.442695, %v351_v45  ;;  %v369_v52 = vmul.f32 1.442695, %v355_v46 }
 0x154   : > { %682 = vpow2.f32 %v365_v44  ;;  %v363_v53 = vmul.f32 1.442695, %v352_v49  ;;  %v371_v54 = vmul.f32 1.442695, %v356_v50 }
 0x155   : > { %684 = vpow2.f32 %v359_v47 }
 0x156   : > { %686 = vpow2.f32 %v367_v48 }
 0x157   : > { %688 = vpow2.f32 %v361_v51 }
 0x158   : > { %690 = vpow2.f32 %v369_v52 }
 0x159   : > { %692 = vpow2.f32 %v363_v53 }
 0x15a   : > { %694 = vpow2.f32 %v371_v54 }
 0x15d   : > { %v681_v55 = vpop.eup %680 }
 0x15e   : > { %v683_v56 = vpop.eup %682  ;;  %v373_v57 = vadd.f32 1.0, %v681_v55 }
 0x15f   : > { %v685_v58 = vpop.eup %684  ;;  %v377_v59 = vadd.f32 1.0, %v683_v56 }
 0x160   : > { %v687_v60 = vpop.eup %686  ;;  %696 = vrcp.f32 %v373_v57  ;;  %v374_v61 = vadd.f32 1.0, %v685_v58 }
 0x161   : > { %v689_v62 = vpop.eup %688  ;;  %698 = vrcp.f32 %v377_v59  ;;  %v378_v63 = vadd.f32 1.0, %v687_v60 }
 0x162   : > { %v691_v0 = vpop.eup %690  ;;  %700 = vrcp.f32 %v374_v61  ;;  %v375_v1 = vadd.f32 1.0, %v689_v62 }
 0x163   : > { %v693_v2 = vpop.eup %692  ;;  %702 = vrcp.f32 %v378_v63  ;;  %v379_v3 = vadd.f32 1.0, %v691_v0 }
 0x164   : > { %v695_v4 = vpop.eup %694  ;;  %704 = vrcp.f32 %v375_v1  ;;  %v376_v5 = vadd.f32 1.0, %v693_v2 }
 0x165   : > { %706 = vrcp.f32 %v379_v3  ;;  %v380_v6 = vadd.f32 1.0, %v695_v4 }
 0x166   : > { %708 = vrcp.f32 %v376_v5 }
 0x167   : > { %710 = vrcp.f32 %v380_v6 }
 0x16a   : > { %v697_v7 = vpop.eup %696 }
 0x16b   : > { %v699_v8 = vpop.eup %698  ;;  %v389_v9 = vmul.f32 %v697_v7, %v1119_v25 }
 0x16c   : > { %v701_v10 = vpop.eup %700  ;;  %v393_v11 = vmul.f32 %v699_v8, %v1121_v26 }
 0x16d   : > { %v703_v12 = vpop.eup %702  ;;  %v390_v13 = vmul.f32 %v701_v10, %v1123_v29 }
 0x16e   : > { %v705_v14 = vpop.eup %704  ;;  %v394_v15 = vmul.f32 %v703_v12, %v1125_v30 }
 0x16f   : > { %v707_v16 = vpop.eup %706  ;;  %v575_v17 = vpack.c.bf16 %v390_v13, %v389_v9  ;;  %v391_v18 = vmul.f32 %v705_v14, %v1129_v35 }
 0x170   : > { %v709_v19 = vpop.eup %708  ;;  %v577_v20 = vpack.c.bf16 %v394_v15, %v393_v11  ;;  %v395_v21 = vmul.f32 %v707_v16, %v1131_v36 }
 0x171   : > { %v711_v22 = vpop.eup %710  ;;  %421 = vst [vmem:[%s235_s22] sm:$0xff] %v575_v17  ;;  %v392_v23 = vmul.f32 %v709_v19, %v1135_v41 }
 0x172   : > { %423 = vst [vmem:[%s235_s22 + $0x10] sm:$0xff] %v577_v20  ;;  %v396_v24 = vmul.f32 %v711_v22, %v1137_v42 }
 0x173   : > { %v576_v25 = vpack.c.bf16 %v392_v23, %v391_v18 }
 0x174   : > { %v578_v26 = vpack.c.bf16 %v396_v24, %v395_v21 }
 0x175   : > { %422 = vst [vmem:[%s235_s22 + $0x8] sm:$0xff] %v576_v25 }
 0x176   : > { %424 = vst [vmem:[%s235_s22 + $0x18] sm:$0xff] %v578_v26 }
 0x177   : > { %811 = shalt.err (!%p808_p11)
}
 0x178   : > { %s812_s11 = scalar_lea.hbm %s1158_s10, 512  ;;  %s816_s29 = scalar_lea.hbm %s1210_s3, 1024 }
 0x179   : > { %p813_p0 = scmp.ne.s32.totalorder %s1158_s10, %s812_s11  ;;  %p817_p6 = scmp.lt.u32.totalorder %s1158_s10, %s1210_s3 }
 0x17a   : > { %p818_p7 = scmp.lt.u32.totalorder %s816_s29, %s812_s11  ;;  %p820_p8 = scmp.lt.u32.totalorder %s812_s11, %s1158_s10 }
 0x17b   : > { %p814_p4 = pnand %p813_p0, %p1225_p2 }
 0x17c   : > { %p819_p12 = por %p818_p7, %p817_p6 }
 0x17d   : > { %p815_p13 = pneg %p814_p4 }
 0x17e   : > { %p821_p1 = por %p820_p8, %p819_p12 }
 0x180   : > { %p822_p10 = pnand %p821_p1, %p815_p13 }
 0x182   : > { %825 = shalt.err (!%p822_p10)
}
 0x183   : > { %s897_s22 = smov 128   ;;  %s898_s8 = smov 8  }
 0x184   : > { %594 = dma.vmem_to_hbm [thread:$0]  (%p1225_p2), %s1152_s24, 512, %s1158_s10, %s426_s15, %s897_s22, %s897_s22, %s898_s8  }
 0x185 PF: > { %s456_s26 = sand.u32 1, %s864_s12   ;;  %p1226_p3 = scmp.ne.s32.totalorder %s1218_s23, 0 }
 0x186   : > { %p1227_p5 = scmp.ge.s32.totalorder %s884_s17, 2  ;;  %s457_s9 = scalar_lea.sflag [#allocation4], %s456_s26 }
 0x188   : > { %p608_p9 = pnand %p1227_p5, %p1226_p3 }
 0x18a   : > { %859 = dma.done.wait (!%p608_p9), %s457_s9, 512  }
 0x18b   : > { %861 = vsyncadd (!%p608_p9), %s457_s9, 4294966784  ;;  %s20_s17 = sadd.s32 1, %s884_s17   ;;  %s1228_s12 = smov %s868_s13 }
 0x18c   : > { %p17_p11 = scmp.ge.s32.totalorder %s20_s17, 4   ;;  %s1229_s13 = smov %s872_s14 }
 0x18d   : > { %s1230_s14 = smov %s1061_s5  ;;  %s1231_s15 = smov %s880_s16 }
 0x18e   : > { %s1232_s16 = smov %s1234_s19  ;;  %19 = sbr.rel (!%p17_p11) target bundleno = 7 (0x7), region = 85 }
 0x195   :  { %462 = vsyncpa [#allocation3], 1 }
 0x196   :  { %464 = vsyncpa [#allocation3 + $0x1], 1 }
 0x197   :  { %465 = vsyncpa [#allocation6], 1 }
 0x198   :  { %466 = vsyncpa [#allocation4], 1 }
 0x199   :  { %468 = vsyncpa [#allocation4 + $0x1], 1 }

</bundles_post_ra>
